<compile_context>
chip_gen: v6e
topology: v6e:2x2x1
jax: 0.10.0
libtpu: 0.0.40
codegen_flags: <defaults>
</compile_context>

<pallas_src>
import functools

import jax
import jax.numpy as jnp
from jax.experimental import pallas as pl
from jax.experimental.pallas import tpu as pltpu


def _nodenorm_kernel(x_ref, o_ref, *, eps: float, power: float,
                     unbiased: bool, d_true: int):
    """Processes one (tile_n, d) block; reduction over the lane axis."""
    x = x_ref[...]
    xf = x.astype(jnp.float32)

    # Single-pass statistics over the true feature dim (block spans full D).
    s = jnp.sum(xf, axis=-1, keepdims=True)            # (tn, 1)
    sq = jnp.sum(xf * xf, axis=-1, keepdims=True)      # (tn, 1)
    inv_d = jnp.float32(1.0 / d_true)
    mean = s * inv_d
    if unbiased:
        denom = jnp.float32(max(d_true - 1, 1))
        var = (sq - s * mean) / denom                  # (sumsq - d*mean^2)/(d-1)
    else:
        var = sq * inv_d - mean * mean
    var = jnp.maximum(var, jnp.float32(0.0))           # cancellation guard

    # y = x / std^power == x * (var + eps)^(-power/2)
    inv_scale = (var + jnp.float32(eps)) ** jnp.float32(-0.5 * power)

    if x.dtype == jnp.bfloat16 and o_ref.dtype == jnp.bfloat16:
        # Keep the final multiply in bf16: no second full-tile f32 temp.
        o_ref[...] = x * inv_scale.astype(jnp.bfloat16)
    else:
        o_ref[...] = (xf * inv_scale).astype(o_ref.dtype)


def node_norm(x: jax.Array,
              unbiased: bool = False,
              eps: float = 1e-5,
              root_power: float = 3.0,
              target_block_bytes: int = 1 << 20) -> jax.Array:
    """NodeNorm forward.  Normalizes over the last axis; any leading dims."""
    orig_shape = x.shape
    d = int(orig_shape[-1])
    x2 = x.reshape(-1, d)
    n = int(x2.shape[0])
    if n == 0 or d == 0:
        return x

    itemsize = jnp.dtype(x.dtype).itemsize
    sublane = max(8, 32 // itemsize)                 # 8 f32 / 16 bf16 / 32 i8

    # Row tile: largest sublane-aligned block around target_block_bytes,
    # never (much) larger than the problem, and small enough that large
    # inputs still get >=8 grid steps (megacore sharding + pipelining).
    n_ceil = ((n + sublane - 1) // sublane) * sublane
    tile_n = max(sublane,
                 (target_block_bytes // max(d * itemsize, 1))
                 // sublane * sublane)
    tile_n = min(tile_n, n_ceil)
    min_steps = 8
    if n_ceil >= sublane * min_steps:
        tile_n = min(tile_n,
                     max(sublane, (n_ceil // min_steps) // sublane * sublane))

    kernel = functools.partial(
        _nodenorm_kernel,
        eps=float(eps),
        power=1.0 / float(root_power),
        unbiased=bool(unbiased),
        d_true=d,
    )

    y2 = pl.pallas_call(
        kernel,
        out_shape=jax.ShapeDtypeStruct((n, d), x.dtype),
        grid_spec=pltpu.PrefetchScalarGridSpec(
            num_scalar_prefetch=0,
            grid=(pl.cdiv(n, tile_n),),
            # Last block dim == full feature dim -> one contiguous HBM DMA per
            # row block; trailing partial row-block is masked by Pallas.
            in_specs=[pl.BlockSpec((tile_n, d), lambda i: (i, 0))],
            out_specs=pl.BlockSpec((tile_n, d), lambda i: (i, 0)),
        ),
        compiler_params=pltpu.CompilerParams(
            dimension_semantics=("parallel",),
            vmem_limit_bytes=32 * 1024 * 1024,
        ),
    )(x2)

    return y2.reshape(orig_shape)


def node_norm_ref(x, unbiased=False, eps=1e-5, root_power=3.0):
    x32 = x.astype(jnp.float32)
    var = jnp.var(x32, axis=-1, keepdims=True, ddof=1 if unbiased else 0)
    std = jnp.sqrt(var + eps)
    return (x32 / std ** (1.0 / root_power)).astype(x.dtype)


if __name__ == "__main__":
    key = jax.random.PRNGKey(0)
    k1, k2 = jax.random.split(key)

    # Small node-feature matrix: 8 nodes x 32 hidden features.
    x = jax.random.normal(k1, (8, 32), dtype=jnp.float32)
    y = jax.block_until_ready(node_norm(x))
    y_ref = node_norm_ref(x)
    assert y.shape == x.shape and y.dtype == x.dtype
    assert jnp.allclose(y, y_ref, atol=2e-5, rtol=2e-5), "mismatch vs reference"

    # Leading batch dims + unbiased variance path.
    x3 = jax.random.normal(k2, (2, 16, 32), dtype=jnp.float32)
    y3 = jax.block_until_ready(node_norm(x3, unbiased=True, root_power=2.0))
    y3_ref = node_norm_ref(x3, unbiased=True, root_power=2.0)
    assert y3.shape == x3.shape
    assert jnp.allclose(y3, y3_ref, atol=2e-5, rtol=2e-5), "mismatch (unbiased)"

    print("KERNEL_OK")
</pallas_src>

<mosaic_0001>
module attributes {stable_mosaic.version = 11 : i64} {
  func.func @_nodenorm_kernel(%arg0: i32, %arg1: memref<8x32xf32, #tpu.memory_space<vmem>>, %arg2: memref<8x32xf32, #tpu.memory_space<vmem>>) attributes {dimension_semantics = [#tpu.dimension_semantics<parallel>], iteration_bounds = array<i64: 1>, scalar_prefetch = 0 : i64, scratch_operands = 0 : i64, tpu.core_type = #tpu.core_type<tc>, window_params = [{transform_indices = @transform_0, window_bounds = array<i64: 8, 32>}, {transform_indices = @transform_1, window_bounds = array<i64: 8, 32>}]} {
    %c0 = arith.constant 0 : index
    %c0_0 = arith.constant 0 : index
    %0 = vector.load %arg1[%c0, %c0_0] : memref<8x32xf32, #tpu.memory_space<vmem>>, vector<8x32xf32>
    %cst = arith.constant dense<0.000000e+00> : vector<8xf32>
    %1 = vector.multi_reduction <add>, %0, %cst [1] : vector<8x32xf32> to vector<8xf32>
    %2 = vector.shape_cast %1 : vector<8xf32> to vector<8x1xf32>
    %3 = arith.mulf %0, %0 : vector<8x32xf32>
    %cst_1 = arith.constant dense<0.000000e+00> : vector<8xf32>
    %4 = vector.multi_reduction <add>, %3, %cst_1 [1] : vector<8x32xf32> to vector<8xf32>
    %5 = vector.shape_cast %4 : vector<8xf32> to vector<8x1xf32>
    %cst_2 = arith.constant 3.125000e-02 : f32
    %6 = vector.broadcast %cst_2 : f32 to vector<8x1xf32>
    %7 = arith.mulf %2, %6 : vector<8x1xf32>
    %cst_3 = arith.constant 3.125000e-02 : f32
    %8 = vector.broadcast %cst_3 : f32 to vector<8x1xf32>
    %9 = arith.mulf %5, %8 : vector<8x1xf32>
    %10 = arith.mulf %7, %7 : vector<8x1xf32>
    %11 = arith.subf %9, %10 : vector<8x1xf32>
    %cst_4 = arith.constant 0.000000e+00 : f32
    %12 = vector.broadcast %cst_4 : f32 to vector<8x1xf32>
    %13 = arith.maximumf %11, %12 : vector<8x1xf32>
    %cst_5 = arith.constant 9.99999974E-6 : f32
    %14 = vector.broadcast %cst_5 : f32 to vector<8x1xf32>
    %15 = arith.addf %13, %14 : vector<8x1xf32>
    %cst_6 = arith.constant -0.166666672 : f32
    %16 = vector.broadcast %cst_6 : f32 to vector<8x1xf32>
    %17 = math.powf %15, %16 : vector<8x1xf32>
    %18 = vector.broadcast %17 : vector<8x1xf32> to vector<8x32xf32>
    %19 = arith.mulf %0, %18 : vector<8x32xf32>
    %c0_7 = arith.constant 0 : index
    %c0_8 = arith.constant 0 : index
    %20 = vector.load %arg2[%c0_7, %c0_8] : memref<8x32xf32, #tpu.memory_space<vmem>>, vector<8x32xf32>
    tpu.vector_store %arg2[%c0_7, %c0_8], %19 {strides = array<i32>} : memref<8x32xf32, #tpu.memory_space<vmem>>, vector<8x32xf32>,
    return
  }
  func.func @transform_0(%arg0: i32) -> (i32, i32) {
    %c0_i32 = arith.constant 0 : i32
    %c0_i32_0 = arith.constant 0 : i32
    return %arg0, %c0_i32 : i32, i32
  }
  func.func @transform_1(%arg0: i32) -> (i32, i32) {
    %c0_i32 = arith.constant 0 : i32
    %c0_i32_0 = arith.constant 0 : i32
    return %arg0, %c0_i32 : i32, i32
  }
}

</mosaic_0001>

<bundles_post_ra>
// kernel: tpu_custom_call.1
= control target key start
LH: loop header
LB: loop body
LE: loop exit
PB: predicated region body
PF: predicated region fallthrough
CT: control target
= control target key end

     0   :  { %6 = vsyncpa [#allocation3], 0  ;;  %s153_s0 = inlined_call_operand.hbm [shape: f32[8,32], index: 0, kind: input, shape index: {}]   ;;  %s154_s1 = inlined_call_operand.hbm [shape: f32[8,32], index: 1, kind: output, shape index: {}]  }
   0x1   :  { %7 = vsyncpa [#allocation4], 0  ;;  %s132_s6 = smov [#allocation2]  }
   0x2   :  { %s14_s7 = sshll.u32 %s132_s6, 4  ;;  %s15_s7 = int_to_ptr.vmem [resolvable:$true] %s14_s7 }
   0x3   :  { %s96_s8 = scalar_lea.vmem %s15_s7, 128  ;;  %p101_p1 = scmp.lt.s32.totalorder %s15_s7, %s15_s7 }
   0x4   :  { %p97_p0 = scmp.ne.s32.totalorder %s15_s7, %s96_s8  ;;  %p102_p2 = scmp.lt.s32.totalorder %s96_s8, %s96_s8 }
   0x6   :  { %p103_p3 = por %p102_p2, %p101_p1 }
   0x8   :  { %p104_p4 = pnand %p103_p3, %p97_p0 }
   0xa   :  { %107 = shalt.err (!%p104_p4)
}
   0xb   :  { %17 = dma.hbm_to_vmem [thread:$0]  %s153_s0, 128, %s15_s7, [#allocation3]  }
   0xc   :  { %128 = dma.done.wait [#allocation3], 128  }
   0xd   :  { %129 = vsyncadd [#allocation3], 4294967168  ;;  %vm22_vm0 = vcmask 261120   ;;  %v21_v0 = vld [vmem:[#allocation2] sm:$0xff]  ;;  %s133_s0 = smov [#allocation5]  }
   0xe   :  { %v23_v1 = vsel %vm22_vm0, %v21_v0, 0.0  ;;  %v26_v2 = vmul.f32 %v21_v0, %v21_v0  ;;  %s45_s11 = sshll.u32 %s133_s0, 4  ;;  %s46_s11 = int_to_ptr.vmem [resolvable:$true] %s45_s11 }
   0xf   :  { %24 = vadd.xlane.f32.xlu0 %v23_v1  ;;  %s108_s12 = scalar_lea.vmem %s46_s11, 128  ;;  %p113_p6 = scmp.lt.s32.totalorder %s46_s11, %s46_s11 }
  0x10   :  { %v27_v3 = vsel %vm22_vm0, %v26_v2, 0.0  ;;  %p109_p5 = scmp.ne.s32.totalorder %s46_s11, %s108_s12  ;;  %p114_p7 = scmp.lt.s32.totalorder %s108_s12, %s108_s12 }
  0x12   :  { %p115_p8 = por %p114_p7, %p113_p6 }
  0x13   :  { %28 = vadd.xlane.f32.xlu0 %v27_v3 }
  0x14   :  { %p116_p9 = pnand %p115_p8, %p109_p5 }
  0x98   :  { %v25_v4 = vpop.xlane.xlu0 %24 }
  0x99   :  { %v30_v5 = vmul.f32 0.03125, %v25_v4 }
  0x9b   :  { %v32_v7 = vmul.f32 %v30_v5, %v30_v5 }
  0x9c   :  { %v29_v6 = vpop.xlane.xlu0 %28 }
  0x9d   :  { %v31_v8 = vmul.f32 0.03125, %v29_v6 }
  0x9f   :  { %v33_v9 = vsub.f32 %v31_v8, %v32_v7 }
  0xa1   :  { %v34_v10 = vmax.f32 %v33_v9, 0.0 }
  0xa3   :  { %v35_v11 = vadd.f32 1e-05, %v34_v10 }
  0xa5   :  { %v58_v12 = vand.u32 2147483647, %v35_v11  ;;  %vm62_vm1 = vcmp.lt.f32.partialorder %v35_v11, 0  ;;  %vm63_vm2 = vcmp.eq.f32.partialorder %v35_v11, 0  ;;  %vm77_vm4 = vcmp.ne.f32.partialorder %v35_v11, %v35_v11 }
  0xa6   :  { %vm64_vm5 = vcmp.eq.f32.partialorder %v35_v11, 1065353216 }
  0xa7   :  { %84 = vlog2.f32 %v58_v12  ;;  %vm67_vm3 = vcmp.eq.f32.partialorder %v58_v12, 2139095040 }
  0xb4   :  { %v85_v13 = vpop.eup %84 }
  0xb5   :  { %v60_v14 = vmul.f32 -0.16666667, %v85_v13 }
  0xb7   :  { %86 = vpow2.f32 %v60_v14 }
  0xc4   :  { %v87_v15 = vpop.eup %86 }
  0xc5   :  { %v68_v16 = vsel %vm62_vm1, 2143289344, %v87_v15 }
  0xc6   :  { %v69_v17 = vsel %vm63_vm2, 2139095040, %v68_v16 }
  0xc7   :  { %v76_v18 = vsel %vm67_vm3, 0, %v69_v17 }
  0xc8   :  { %v80_v19 = vsel %vm77_vm4, 2143289344, %v76_v18 }
  0xc9   :  { %v81_v20 = vsel %vm64_vm5, 1065353216, %v80_v19 }
  0xca   :  { %v37_v21 = vmul.f32 %v81_v20, %v21_v0 }
  0xcc   :  { %38 = vst.msk [vmem:[#allocation5] sm:$0xff] %vm22_vm0, %v37_v21 }
  0xcd   :  { %119 = shalt.err (!%p116_p9)
}
  0xce   :  { %48 = dma.vmem_to_hbm [thread:$0]  %s46_s11, 128, %s154_s1, [#allocation4]  }
  0xcf   :  { %130 = dma.done.wait [#allocation4], 128  }
  0xd0   :  { %131 = vsyncadd [#allocation4], 4294967168 }
  0xd1   :  { %52 = vsyncpa [#allocation3], 1 }
  0xd2   :  { %53 = vsyncpa [#allocation4], 1 }

</bundles_post_ra>
